<compile_context>
chip_gen: v7x
topology: tpu7x:2x2x1
jax: 0.10.0
libtpu: 0.0.40
codegen_flags: <defaults>
</compile_context>

<pallas_src>
import math

import jax
import jax.numpy as jnp
from jax.experimental import pallas as pl
from jax.experimental.pallas import tpu as pltpu

_LANES = 128
_NEG_CLAMP = -100.0  # PyTorch nn.BCELoss clamps log terms at -100.


def _choose_rows_tile(rows, max_rows):
    """Pick a sublane-aligned row tile that never exceeds `rows`."""
    if rows <= 8:
        return rows, 1                        # single block == full dim
    max_aligned = (rows // 8) * 8             # largest 8-aligned tile <= rows
    target = max(8, min(max_rows, max_aligned))
    n_tiles = -(-rows // target)
    rows_tile = -(-rows // n_tiles)
    rows_tile = -(-rows_tile // 8) * 8        # round up to multiple of 8
    rows_tile = min(rows_tile, max_aligned)
    n_tiles = -(-rows // rows_tile)
    return rows_tile, n_tiles


def _make_kernel(rows_tile, inner_tiles, sub_rows, n_elems, needs_mask):
    def kernel(pred_ref, tgt_ref, acc_ref):
        i = pl.program_id(2)

        @pl.when(i == 0)
        def _():
            acc_ref[...] = jnp.zeros_like(acc_ref)

        p = pred_ref[0].astype(jnp.float32)      # (rows_tile, 128)
        t = tgt_ref[0].astype(jnp.float32)

        if needs_mask:
            # Ragged tail handled in-kernel (no host-side padding to the tile
            # multiple): global flat element index vs. true per-batch size.
            k = pl.program_id(1) * inner_tiles + i
            row = jax.lax.broadcasted_iota(jnp.int32, (rows_tile, _LANES), 0)
            lane = jax.lax.broadcasted_iota(jnp.int32, (rows_tile, _LANES), 1)
            flat = (k * rows_tile + row) * _LANES + lane
            valid = flat < n_elems
            p = jnp.where(valid, p, 0.0)
            t = jnp.where(valid, t, 0.0)

        # BCE element = -(t*log(p) + (1-t)*log(1-p)) with logs clamped at -100
        # (nn.BCELoss semantics), rewritten as t*(log1mp - logp) - log1mp.
        # Masked elements (p = t = 0) contribute exactly 0.
        log_p = jnp.maximum(jnp.log(p), _NEG_CLAMP)
        log_1mp = jnp.maximum(jnp.log(1.0 - p), _NEG_CLAMP)
        bce = t * (log_1mp - log_p) - log_1mp

        def fold(x):
            # (rows_tile, 128) -> (sub_rows, 128) with full-vreg VPU adds; the
            # intra-vreg sublane/lane reduce is deferred to the wrapper.
            if rows_tile == sub_rows:
                return x
            return x.reshape(rows_tile // sub_rows, sub_rows, _LANES).sum(axis=0)

        acc_ref[0, 0, 0] += fold(p * t)          # intersection
        acc_ref[0, 0, 1] += fold(p + t)          # fused pred_sum + target_sum
        acc_ref[0, 0, 2] += fold(bce)            # bce sum

    return kernel


def bce_dice_loss(pred, target, *, max_rows_per_tile=2048, num_parallel_chunks=2):
    """BCE + Dice loss matching PyTorch BceDiceLoss.forward.

    pred, target: (B, ...) arrays; pred must already be probabilities in
    (0, 1) (nn.BCELoss semantics).  Streamed in their native dtype.
    """
    B = pred.shape[0]
    N = math.prod(pred.shape[1:])

    rows = -(-N // _LANES)                       # ceil(N / 128)
    rows_tile, n_tiles = _choose_rows_tile(rows, max_rows_per_tile)
    n_chunks = max(1, min(num_parallel_chunks, n_tiles))
    inner_tiles = -(-n_tiles // n_chunks)
    sub_rows = 8 if rows_tile >= 8 else rows_tile
    needs_mask = (n_chunks * inner_tiles * rows_tile * _LANES) != N

    lane_pad = rows * _LANES - N

    def _prep(x):
        x = x.reshape(B, N)
        if lane_pad:
            # Only when N is not a multiple of 128 (<= 127 elems per batch);
            # the row-tile raggedness itself is masked inside the kernel.
            x = jnp.pad(x, ((0, 0), (0, lane_pad)))
        return x.reshape(B, rows, _LANES)

    pred3 = _prep(pred)
    tgt3 = _prep(target)

    if n_chunks * inner_tiles == n_tiles:
        def in_map(b, c, i):
            return (b, c * inner_tiles + i, 0)
    else:
        def in_map(b, c, i):
            # Clamp fully out-of-range logical blocks; their contribution is
            # zeroed by the in-kernel mask.
            return (b, jnp.minimum(c * inner_tiles + i, n_tiles - 1), 0)

    itemsize = pred3.dtype.itemsize + tgt3.dtype.itemsize
    block_bytes = rows_tile * _LANES * itemsize
    # 2x double-buffered input blocks + headroom for f32 temps / output.
    vmem_limit = int(min(max(4 * block_bytes + (12 << 20), 16 << 20), 48 << 20))

    partials = pl.pallas_call(
        _make_kernel(rows_tile, inner_tiles, sub_rows, N, needs_mask),
        out_shape=jax.ShapeDtypeStruct((B, n_chunks, 3, sub_rows, _LANES),
                                       jnp.float32),
        grid_spec=pltpu.PrefetchScalarGridSpec(
            num_scalar_prefetch=0,
            grid=(B, n_chunks, inner_tiles),
            in_specs=[
                pl.BlockSpec((1, rows_tile, _LANES), in_map),
                pl.BlockSpec((1, rows_tile, _LANES), in_map),
            ],
            out_specs=pl.BlockSpec((1, 1, 3, sub_rows, _LANES),
                                   lambda b, c, i: (b, c, 0, 0, 0)),
        ),
        compiler_params=pltpu.CompilerParams(
            dimension_semantics=("parallel", "parallel", "arbitrary"),
            vmem_limit_bytes=vmem_limit),
    )(pred3, tgt3)

    # Tiny finalize: fold chunks + sublanes + lanes, then combine.
    sums = jnp.sum(partials, axis=(1, 3, 4))     # (B, 3)
    inter, pt_sum, bce_sum = sums[:, 0], sums[:, 1], sums[:, 2]

    smooth = 1.0
    dice_score = (2.0 * inter + smooth) / (pt_sum + smooth)
    dice_loss = 1.0 - jnp.sum(dice_score) / float(B)
    bce_loss = jnp.sum(bce_sum) / float(B * N)
    return dice_loss + bce_loss


def _reference(pred, target):
    B = pred.shape[0]
    p = pred.reshape(B, -1).astype(jnp.float32)
    t = target.reshape(B, -1).astype(jnp.float32)
    bce = jnp.mean(-(t * jnp.maximum(jnp.log(p), _NEG_CLAMP)
                     + (1.0 - t) * jnp.maximum(jnp.log(1.0 - p), _NEG_CLAMP)))
    smooth = 1.0
    inter = jnp.sum(p * t, axis=1)
    dice = (2.0 * inter + smooth) / (jnp.sum(p, axis=1) + jnp.sum(t, axis=1) + smooth)
    return 1.0 - jnp.sum(dice) / B + bce


if __name__ == "__main__":
    key = jax.random.PRNGKey(0)

    cases = [
        # (shape, kwargs) — primary case plus shapes exercising the in-kernel
        # mask, the chunked reduction, and the clamped OOB-block path.
        ((2, 4, 16, 16), {}),
        ((2, 3, 10, 11), {}),
        ((1, 8, 64, 64), dict(max_rows_per_tile=64)),
        ((2, 3, 40, 40), dict(max_rows_per_tile=16)),
    ]

    ok = True
    for shape, kw in cases:
        key, k1, k2 = jax.random.split(key, 3)
        # pred is assumed to already be a probability map (post-sigmoid), as
        # nn.BCELoss requires inputs in (0, 1).
        pred = jax.nn.sigmoid(jax.random.normal(k1, shape, jnp.float32))
        target = jax.random.bernoulli(k2, 0.5, shape).astype(jnp.float32)

        loss = jax.block_until_ready(bce_dice_loss(pred, target, **kw))
        ref = _reference(pred, target)
        if not jnp.allclose(loss, ref, rtol=1e-4, atol=1e-5):
            ok = False
            print("MISMATCH", shape, float(loss), float(ref))

    if ok:
        print("KERNEL_OK")
</pallas_src>

<mosaic_0001>
module attributes {stable_mosaic.version = 11 : i64} {
  func.func @kernel(%arg0: i32, %arg1: i32, %arg2: i32, %arg3: memref<1x8x128xf32, #tpu.memory_space<vmem>>, %arg4: memref<1x8x128xf32, #tpu.memory_space<vmem>>, %arg5: memref<1x1x3x8x128xf32, #tpu.memory_space<vmem>>) attributes {dimension_semantics = [#tpu.dimension_semantics<parallel>, #tpu.dimension_semantics<parallel>, #tpu.dimension_semantics<arbitrary>], iteration_bounds = array<i64: 2, 1, 1>, scalar_prefetch = 0 : i64, scratch_operands = 0 : i64, tpu.core_type = #tpu.core_type<tc>, window_params = [{transform_indices = @transform_0, window_bounds = array<i64: 1, 8, 128>}, {transform_indices = @transform_1, window_bounds = array<i64: 1, 8, 128>}, {transform_indices = @transform_2, window_bounds = array<i64: 1, 1, 3, 8, 128>}]} {
    %c0_i32 = arith.constant 0 : i32
    %0 = arith.cmpi eq, %arg2, %c0_i32 : i32
    %1 = arith.extui %0 : i1 to i32
    %c0_i32_0 = arith.constant 0 : i32
    %2 = arith.cmpi ne, %1, %c0_i32_0 : i32
    scf.if %2 {
      %cst_36 = arith.constant 0.000000e+00 : f32
      %38 = vector.broadcast %cst_36 : f32 to vector<1x1x3x8x128xf32>
      %c0_37 = arith.constant 0 : index
      %c0_38 = arith.constant 0 : index
      %c0_39 = arith.constant 0 : index
      %c0_40 = arith.constant 0 : index
      %c0_41 = arith.constant 0 : index
      %39 = vector.load %arg5[%c0_37, %c0_38, %c0_39, %c0_40, %c0_41] : memref<1x1x3x8x128xf32, #tpu.memory_space<vmem>>, vector<1x1x3x8x128xf32>
      tpu.vector_store %arg5[%c0_37, %c0_38, %c0_39, %c0_40, %c0_41], %38 {strides = array<i32>} : memref<1x1x3x8x128xf32, #tpu.memory_space<vmem>>, vector<1x1x3x8x128xf32>,
    } else {
    }
    %c0 = arith.constant 0 : index
    %c0_1 = arith.constant 0 : index
    %c0_2 = arith.constant 0 : index
    %3 = vector.load %arg3[%c0, %c0_1, %c0_2] : memref<1x8x128xf32, #tpu.memory_space<vmem>>, vector<1x8x128xf32>
    %4 = vector.shape_cast %3 : vector<1x8x128xf32> to vector<8x128xf32>
    %c0_3 = arith.constant 0 : index
    %c0_4 = arith.constant 0 : index
    %c0_5 = arith.constant 0 : index
    %5 = vector.load %arg4[%c0_3, %c0_4, %c0_5] : memref<1x8x128xf32, #tpu.memory_space<vmem>>, vector<1x8x128xf32>
    %6 = vector.shape_cast %5 : vector<1x8x128xf32> to vector<8x128xf32>
    %7 = math.log %4 : vector<8x128xf32>
    %cst = arith.constant -1.000000e+02 : f32
    %8 = vector.broadcast %cst : f32 to vector<8x128xf32>
    %9 = arith.maximumf %7, %8 : vector<8x128xf32>
    %cst_6 = arith.constant 1.000000e+00 : f32
    %10 = vector.broadcast %cst_6 : f32 to vector<8x128xf32>
    %11 = arith.subf %10, %4 : vector<8x128xf32>
    %12 = math.log %11 : vector<8x128xf32>
    %cst_7 = arith.constant -1.000000e+02 : f32
    %13 = vector.broadcast %cst_7 : f32 to vector<8x128xf32>
    %14 = arith.maximumf %12, %13 : vector<8x128xf32>
    %15 = arith.subf %14, %9 : vector<8x128xf32>
    %16 = arith.mulf %6, %15 : vector<8x128xf32>
    %17 = arith.subf %16, %14 : vector<8x128xf32>
    %c0_8 = arith.constant 0 : index
    %c0_9 = arith.constant 0 : index
    %c0_10 = arith.constant 0 : index
    %c0_11 = arith.constant 0 : index
    %c0_12 = arith.constant 0 : index
    %18 = vector.load %arg5[%c0_8, %c0_9, %c0_10, %c0_11, %c0_12] : memref<1x1x3x8x128xf32, #tpu.memory_space<vmem>>, vector<1x1x1x8x128xf32>
    %19 = vector.shape_cast %18 : vector<1x1x1x8x128xf32> to vector<8x128xf32>
    %20 = arith.mulf %4, %6 : vector<8x128xf32>
    %21 = arith.addf %19, %20 : vector<8x128xf32>
    %c0_13 = arith.constant 0 : index
    %c0_14 = arith.constant 0 : index
    %c0_15 = arith.constant 0 : index
    %c0_16 = arith.constant 0 : index
    %c0_17 = arith.constant 0 : index
    %22 = vector.load %arg5[%c0_13, %c0_14, %c0_15, %c0_16, %c0_17] : memref<1x1x3x8x128xf32, #tpu.memory_space<vmem>>, vector<1x1x1x8x128xf32>
    %23 = vector.shape_cast %22 : vector<1x1x1x8x128xf32> to vector<8x128xf32>
    %24 = vector.shape_cast %21 : vector<8x128xf32> to vector<1x1x1x8x128xf32>
    tpu.vector_store %arg5[%c0_13, %c0_14, %c0_15, %c0_16, %c0_17], %24 {strides = array<i32>} : memref<1x1x3x8x128xf32, #tpu.memory_space<vmem>>, vector<1x1x1x8x128xf32>,
    %c0_18 = arith.constant 0 : index
    %c0_19 = arith.constant 0 : index
    %c1 = arith.constant 1 : index
    %c0_20 = arith.constant 0 : index
    %c0_21 = arith.constant 0 : index
    %25 = vector.load %arg5[%c0_18, %c0_19, %c1, %c0_20, %c0_21] : memref<1x1x3x8x128xf32, #tpu.memory_space<vmem>>, vector<1x1x1x8x128xf32>
    %26 = vector.shape_cast %25 : vector<1x1x1x8x128xf32> to vector<8x128xf32>
    %27 = arith.addf %4, %6 : vector<8x128xf32>
    %28 = arith.addf %26, %27 : vector<8x128xf32>
    %c0_22 = arith.constant 0 : index
    %c0_23 = arith.constant 0 : index
    %c1_24 = arith.constant 1 : index
    %c0_25 = arith.constant 0 : index
    %c0_26 = arith.constant 0 : index
    %29 = vector.load %arg5[%c0_22, %c0_23, %c1_24, %c0_25, %c0_26] : memref<1x1x3x8x128xf32, #tpu.memory_space<vmem>>, vector<1x1x1x8x128xf32>
    %30 = vector.shape_cast %29 : vector<1x1x1x8x128xf32> to vector<8x128xf32>
    %31 = vector.shape_cast %28 : vector<8x128xf32> to vector<1x1x1x8x128xf32>
    tpu.vector_store %arg5[%c0_22, %c0_23, %c1_24, %c0_25, %c0_26], %31 {strides = array<i32>} : memref<1x1x3x8x128xf32, #tpu.memory_space<vmem>>, vector<1x1x1x8x128xf32>,
    %c0_27 = arith.constant 0 : index
    %c0_28 = arith.constant 0 : index
    %c2 = arith.constant 2 : index
    %c0_29 = arith.constant 0 : index
    %c0_30 = arith.constant 0 : index
    %32 = vector.load %arg5[%c0_27, %c0_28, %c2, %c0_29, %c0_30] : memref<1x1x3x8x128xf32, #tpu.memory_space<vmem>>, vector<1x1x1x8x128xf32>
    %33 = vector.shape_cast %32 : vector<1x1x1x8x128xf32> to vector<8x128xf32>
    %34 = arith.addf %33, %17 : vector<8x128xf32>
    %c0_31 = arith.constant 0 : index
    %c0_32 = arith.constant 0 : index
    %c2_33 = arith.constant 2 : index
    %c0_34 = arith.constant 0 : index
    %c0_35 = arith.constant 0 : index
    %35 = vector.load %arg5[%c0_31, %c0_32, %c2_33, %c0_34, %c0_35] : memref<1x1x3x8x128xf32, #tpu.memory_space<vmem>>, vector<1x1x1x8x128xf32>
    %36 = vector.shape_cast %35 : vector<1x1x1x8x128xf32> to vector<8x128xf32>
    %37 = vector.shape_cast %34 : vector<8x128xf32> to vector<1x1x1x8x128xf32>
    tpu.vector_store %arg5[%c0_31, %c0_32, %c2_33, %c0_34, %c0_35], %37 {strides = array<i32>} : memref<1x1x3x8x128xf32, #tpu.memory_space<vmem>>, vector<1x1x1x8x128xf32>,
    return
  }
  func.func @transform_0(%arg0: i32, %arg1: i32, %arg2: i32) -> (i32, i32, i32) {
    %c1_i32 = arith.constant 1 : i32
    %0 = arith.muli %arg1, %c1_i32 : i32
    %1 = arith.addi %0, %arg2 : i32
    %c0_i32 = arith.constant 0 : i32
    %c0_i32_0 = arith.constant 0 : i32
    return %arg0, %1, %c0_i32 : i32, i32, i32
  }
  func.func @transform_1(%arg0: i32, %arg1: i32, %arg2: i32) -> (i32, i32, i32) {
    %c1_i32 = arith.constant 1 : i32
    %0 = arith.muli %arg1, %c1_i32 : i32
    %1 = arith.addi %0, %arg2 : i32
    %c0_i32 = arith.constant 0 : i32
    %c0_i32_0 = arith.constant 0 : i32
    return %arg0, %1, %c0_i32 : i32, i32, i32
  }
  func.func @transform_2(%arg0: i32, %arg1: i32, %arg2: i32) -> (i32, i32, i32, i32, i32) {
    %c0_i32 = arith.constant 0 : i32
    %c0_i32_0 = arith.constant 0 : i32
    %c0_i32_1 = arith.constant 0 : i32
    %c0_i32_2 = arith.constant 0 : i32
    return %arg0, %arg1, %c0_i32, %c0_i32_0, %c0_i32_1 : i32, i32, i32, i32, i32
  }
}

</mosaic_0001>

<bundles_post_ra>
// kernel: tpu_custom_call.1
= control target key start
LH: loop header
LB: loop body
LE: loop exit
PB: predicated region body
PF: predicated region fallthrough
CT: control target
= control target key end

     0   :  { %7 = vsyncpa [#allocation3], 0  ;;  %s878_s0 = inlined_call_operand.hbm [shape: f32[2,8,128], index: 0, kind: input, shape index: {}]   ;;  %s879_s1 = inlined_call_operand.hbm [shape: f32[2,8,128], index: 1, kind: input, shape index: {}]   ;;  %s880_s2 = inlined_call_operand.hbm [shape: f32[2,1,3,8,128], index: 2, kind: output, shape index: {}]  }
   0x1   :  { %9 = vsyncpa [#allocation3 + $0x1], 0 }
   0x2   :  { %10 = vsyncpa [#allocation6], 0 }
   0x3   :  { %12 = vsyncpa [#allocation6 + $0x1], 0 }
   0x4   :  { %13 = vsyncpa [#allocation4], 0 }
   0x5   :  { %15 = vsyncpa [#allocation4 + $0x1], 0  ;;  %s655_s9 = smov 0   ;;  %s657_s10 = smov 0  }
   0x6   :  { %s659_s11 = smov 0   ;;  %s661_s12 = smov 0  }
   0x7   :  { %s663_s13 = smov 0   ;;  %s665_s14 = smov 0  }
   0x8 LB: > { %s393_s15 = sadd.s32 4294967295, %s633_s14   ;;  %s394_s16 = sadd.s32 4294967294, %s633_s14   ;;  %s633_s14 = sphi %s665_s14, %s21_s14   ;;  %s629_s13 = sphi %s663_s13, %s900_s13   ;;  %s625_s12 = sphi %s661_s12, %s899_s12   ;;  %s621_s11 = sphi %s659_s11, %s898_s11   ;;  %s617_s10 = sphi %s657_s10, %s897_s10   ;;  %s613_s9 = sphi %s655_s9, %s896_s9  }
   0x9   : > { %s40_s17 = sadd.s32 1, %s629_s13  ;;  %s51_s18 = sadd.s32 1, %s621_s11 }
   0xa   : > { %p42_p0 = scmp.ge.s32.totalorder %s40_s17, 2  ;;  %p58_p1 = scmp.ne.s32.totalorder %s621_s11, %s617_s10 }
   0xb   : > { %p59_p2 = scmp.eq.s32.totalorder %s633_s14, 0  ;;  %p64_p3 = scmp.ne.s32.totalorder %s617_s10, %s613_s9 }
   0xc   : > { %s902_s17 = smov (%p42_p0, %s40_s17), 0  ;;  %p65_p5 = scmp.eq.s32.totalorder %s393_s15, 0 }
   0xd   : > { %p696_p4 = por %p59_p2, %p58_p1  ;;  %s46_s20 = ssub.s32 %s629_s13, %s902_s17 }
   0xe   : > { %p120_p6 = scmp.eq.s32.totalorder %s393_s15, 1  ;;  %p49_p7 = scmp.eq.s32.totalorder %s46_s20, 0 }
   0xf   : > { %p702_p8 = por %p65_p5, %p64_p3  ;;  %p126_p10 = scmp.eq.s32.totalorder %s394_s16, 1 }
  0x10   : > { %p706_p9 = por %p120_p6, %p58_p1  ;;  %p430_p13 = scmp.lt.s32.totalorder %s633_s14, 2 }
  0x11   : > { %s884_s21 = scalar_select %p702_p8, 1, 0 }
  0x12   : > { %s885_s22 = scalar_select %p706_p9, 1, 0 }
  0x13   : > { %s711_s23 = scalar_select %p49_p7, %s621_s11, %s51_s18  }
  0x14   : > { %p713_p11 = por %p126_p10, %p64_p3  ;;  %s720_s25 = sand.u32 1, %s621_s11  }
  0x15   : > { %s397_s26 = sshll.u32 %s720_s25, 3  ;;  %s398_s27 = sshll.u32 %s629_s13, 7 }
  0x16   : > { %s886_s24 = scalar_select %p713_p11, 1, 0 }
  0x17   : > { %s729_s30 = scalar_lea.hbm %s878_s0, %s398_s27  ;;  %s150_s3 = scalar_lea.vmem [#allocation2], %s397_s26 }
  0x18   : > { %s159_s4 = sshll.u32 %s150_s3, 4  ;;  %p737_p0 = pnand %p430_p13, %p696_p4  ;;  %s733_s4 = int_to_ptr.vmem [resolvable:$true] %s159_s4 }
  0x19   : > { %s147_s6 = scalar_lea.sflag [#allocation3], %s720_s25  ;;  %s487_s7 = scalar_lea.hbm %s729_s30, 128 }
  0x1a   : > { %p488_p3 = scmp.ne.s32.totalorder %s729_s30, %s487_s7  ;;  %p489_p5 = pneg %p737_p0 }
  0x1b   : > { %s492_s16 = scalar_lea.hbm %s878_s0, 256  ;;  %p493_p4 = scmp.lt.u32.totalorder %s729_s30, %s878_s0 }
  0x1c   : > { %p490_p6 = pnand %p489_p5, %p488_p3  ;;  %p494_p10 = scmp.lt.u32.totalorder %s492_s16, %s487_s7 }
  0x1d   : > { %p496_p12 = scmp.lt.u32.totalorder %s487_s7, %s729_s30 }
  0x1e   : > { %p491_p7 = pneg %p490_p6  ;;  %p495_p13 = por %p494_p10, %p493_p4 }
  0x20   : > { %p497_p1 = por %p496_p12, %p495_p13 }
  0x22   : > { %p498_p2 = pnand %p497_p1, %p491_p7 }
  0x24   : > { %501 = shalt.err (!%p498_p2)
}
  0x25   : > { %s502_s20 = scalar_lea.vmem %s733_s4, 128  ;;  %s635_s28 = smov [#allocation2]  }
  0x26   : > { %p503_p3 = scmp.ne.s32.totalorder %s733_s4, %s502_s20  ;;  %s507_s29 = sshll.u32 %s635_s28, 4  ;;  %s508_s29 = int_to_ptr.vmem [resolvable:$false] %s507_s29 }
  0x27   : > { %s509_s3 = scalar_lea.vmem %s508_s29, 256  ;;  %p510_p9 = scmp.lt.s32.totalorder %s733_s4, %s508_s29 }
  0x28   : > { %p505_p6 = pnand %p503_p3, %p489_p5  ;;  %p511_p4 = scmp.lt.s32.totalorder %s509_s3, %s502_s20 }
  0x2a   : > { %p506_p11 = pneg %p505_p6  ;;  %p512_p10 = por %p511_p4, %p510_p9 }
  0x2c   : > { %p513_p12 = pnand %p512_p10, %p506_p11 }
  0x2e   : > { %516 = shalt.err (!%p513_p12)
}
  0x2f   : > { %422 = dma.hbm_to_vmem [thread:$0]  (!%p737_p0), %s729_s30, 128, %s733_s4, %s147_s6  }
  0x30   : > { %p888_p1 = scmp.lt.s32.totalorder %s633_s14, 3  ;;  %p889_p2 = scmp.ge.s32.totalorder %s633_s14, 1 }
  0x31   : > { %s782_s16 = scalar_lea.hbm %s879_s1, %s398_s27  ;;  %s170_s18 = scalar_lea.vmem [#allocation5], %s397_s26 }
  0x32   : > { %p773_p7 = pnand %p889_p2, %p888_p1  ;;  %s179_s19 = sshll.u32 %s170_s18, 4  ;;  %s180_s19 = int_to_ptr.vmem [resolvable:$true] %s179_s19 }
  0x33   : > { %s167_s30 = scalar_lea.sflag [#allocation6], %s720_s25  ;;  %s517_s4 = scalar_lea.hbm %s782_s16, 128 }
  0x34   : > { %s890_s7 = scalar_select %p773_p7, 1, 0 }
  0x35   : > { %p518_p9 = scmp.ne.s32.totalorder %s782_s16, %s517_s4  ;;  %s522_s27 = scalar_lea.hbm %s879_s1, 256 }
  0x36   : > { %p523_p3 = scmp.lt.u32.totalorder %s782_s16, %s879_s1  ;;  %p524_p6 = scmp.lt.u32.totalorder %s522_s27, %s517_s4 }
  0x37   : > { %p520_p11 = pnand %p518_p9, %p489_p5  ;;  %p526_p10 = scmp.lt.u32.totalorder %s517_s4, %s782_s16 }
  0x38   : > { %p525_p4 = por %p524_p6, %p523_p3 }
  0x39   : > { %p521_p13 = pneg %p520_p11 }
  0x3a   : > { %p527_p12 = por %p526_p10, %p525_p4 }
  0x3c   : > { %p528_p1 = pnand %p527_p12, %p521_p13 }
  0x3e   : > { %531 = shalt.err (!%p528_p1)
}
  0x3f   : > { %s532_s25 = scalar_lea.vmem %s180_s19, 128  ;;  %s636_s26 = smov [#allocation5]  }
  0x40   : > { %p533_p2 = scmp.ne.s32.totalorder %s180_s19, %s532_s25  ;;  %s537_s3 = sshll.u32 %s636_s26, 4  ;;  %s538_s3 = int_to_ptr.vmem [resolvable:$false] %s537_s3 }
  0x41   : > { %s539_s8 = scalar_lea.vmem %s538_s3, 256  ;;  %p540_p8 = scmp.lt.s32.totalorder %s180_s19, %s538_s3 }
  0x42   : > { %p535_p9 = pnand %p533_p2, %p489_p5  ;;  %p541_p7 = scmp.lt.s32.totalorder %s539_s8, %s532_s25 }
  0x44   : > { %p536_p11 = pneg %p535_p9  ;;  %p542_p3 = por %p541_p7, %p540_p8 }
  0x46   : > { %p543_p6 = pnand %p542_p3, %p536_p11 }
  0x48   : > { %546 = shalt.err (!%p543_p6)
}
  0x49   : > { %425 = dma.hbm_to_vmem [thread:$0]  (!%p737_p0), %s782_s16, 128, %s180_s19, %s167_s30  }
  0x4a   : > { %p891_p13 = scmp.ne.s32.totalorder %s890_s7, 0 }
  0x4b   : > { %s809_s15 = sand.u32 (!%p891_p13), 1, %s617_s10   ;;  %p892_p5 = scmp.ne.s32.totalorder (!%p891_p13), %s884_s21, 0 }
  0x4c   : > { %188 = sbr.rel (%p891_p13) target bundleno = 125 (0x7d), region = 28  ;;  %s402_s18 = sshll.u32 (!%p891_p13), %s809_s15, 3 }
  0x4d   : > { %s191_s4 = scalar_lea.sflag (!%p891_p13), [#allocation3], %s809_s15  ;;  %s194_s6 = scalar_lea.vmem (!%p891_p13), [#allocation2], %s402_s18 }
  0x53   : > { %600 = dma.done.wait (%p892_p5), %s191_s4, 128  }
  0x54   : > { %602 = vsyncadd (%p892_p5), %s191_s4, 4294967168  ;;  %s200_s5 = scalar_lea.sflag [#allocation6], %s809_s15  ;;  %s203_s16 = scalar_lea.vmem [#allocation5], %s402_s18 }
  0x55   : > { %604 = dma.done.wait (%p892_p5), %s200_s5, 128  }
  0x56   : > { %606 = vsyncadd (%p892_p5), %s200_s5, 4294967168  ;;  %s411_s7 = smul.u32 24, %s809_s15  ;;  %v238_v0 = vld [vmem:[%s194_s6] sm:$0xff]  ;;  %v239_v1 = vld [vmem:[%s203_s16] sm:$0xff]  ;;  %s264_s29 = scalar_lea.sflag [#allocation4], %s809_s15 }
  0x57   : > { %483 = vlog2.f32 %v238_v0  ;;  %v251_v2 = vmul.f32 %v239_v1, %v238_v0  ;;  %v256_v3 = vadd.f32 %v239_v1, %v238_v0  ;;  %v243_v4 = vsub.f32 1.0, %v238_v0  ;;  %s412_s21 = smul.u32 384, %s625_s12  ;;  %p893_p0 = scmp.ne.s32.totalorder %s885_s22, 0 }
  0x58   : > { %s228_s19 = scalar_lea.vmem [#allocation7], %s411_s7  ;;  %s637_s12 = smov [#allocation7]  }
  0x59   : > { %485 = vlog2.f32 %v243_v4  ;;  %253 = vst [vmem:[%s228_s19] sm:$0xff] %v251_v2  ;;  %405 = vst [vmem:[%s228_s19 + $0x8] sm:$0xff] %v256_v3  ;;  %s279_s30 = sshll.u32 %s228_s19, 4  ;;  %s827_s28 = scalar_lea.hbm %s880_s2, %s412_s21  ;;  %s829_s30 = int_to_ptr.vmem [resolvable:$true] %s279_s30 }
  0x5a   : > { %s547_s25 = scalar_lea.vmem %s829_s30, 384  ;;  %s551_s26 = sshll.u32 %s637_s12, 4  ;;  %s552_s26 = int_to_ptr.vmem [resolvable:$false] %s551_s26 }
  0x5b   : > { %p548_p8 = scmp.ne.s32.totalorder %s829_s30, %s547_s25  ;;  %s553_s3 = scalar_lea.vmem %s552_s26, 768 }
  0x5c   : > { %p554_p10 = scmp.lt.s32.totalorder %s829_s30, %s552_s26  ;;  %p555_p12 = scmp.lt.s32.totalorder %s553_s3, %s547_s25 }
  0x5d   : > { %p549_p7 = pnand %p548_p8, %p893_p0 }
  0x5e   : > { %p556_p1 = por %p555_p12, %p554_p10 }
  0x5f   : > { %p550_p4 = pneg %p549_p7 }
  0x61   : > { %v484_v5 = vpop.eup %483  ;;  %p557_p2 = pnand %p556_p1, %p550_p4 }
  0x62   : > { %v241_v6 = vmul.f32 0.6931472, %v484_v5 }
  0x63   : > { %v486_v7 = vpop.eup %485 }
  0x64   : > { %v242_v8 = vmax.f32 %v241_v6, -100.0  ;;  %v245_v9 = vmul.f32 0.6931472, %v486_v7 }
  0x66   : > { %v246_v10 = vmax.f32 %v245_v9, -100.0 }
  0x68   : > { %v247_v11 = vsub.f32 %v246_v10, %v242_v8 }
  0x6a   : > { %v248_v12 = vmul.f32 %v247_v11, %v239_v1 }
  0x6c   : > { %v249_v13 = vsub.f32 %v248_v12, %v246_v10 }
  0x6e   : > { %407 = vst [vmem:[%s228_s19 + $0x10] sm:$0xff] %v249_v13 }
  0x6f   : > { %560 = shalt.err (!%p557_p2)
}
  0x70   : > { %s561_s8 = scalar_lea.hbm %s827_s28, 384  ;;  %s565_s6 = scalar_lea.hbm %s880_s2, 768 }
  0x71   : > { %p562_p9 = scmp.ne.s32.totalorder %s827_s28, %s561_s8  ;;  %p566_p6 = scmp.lt.u32.totalorder %s827_s28, %s880_s2 }
  0x72   : > { %p567_p13 = scmp.lt.u32.totalorder %s565_s6, %s561_s8  ;;  %p569_p8 = scmp.lt.u32.totalorder %s561_s8, %s827_s28 }
  0x73   : > { %p563_p11 = pnand %p562_p9, %p893_p0 }
  0x74   : > { %p568_p5 = por %p567_p13, %p566_p6 }
  0x75   : > { %p564_p3 = pneg %p563_p11 }
  0x76   : > { %p570_p7 = por %p569_p8, %p568_p5 }
  0x78   : > { %p571_p4 = pnand %p570_p7, %p564_p3 }
  0x7a   : > { %574 = shalt.err (!%p571_p4)
}
  0x7b   : > { %s638_s7 = smov 128   ;;  %s639_s19 = smov 8  }
  0x7c   : > { %417 = dma.vmem_to_hbm [thread:$0]  (%p893_p0), %s829_s30, 384, %s827_s28, %s264_s29, %s638_s7, %s638_s7, %s639_s19  }
  0x7d PF: > { %s294_s21 = sand.u32 1, %s613_s9   ;;  %p894_p10 = scmp.ne.s32.totalorder %s886_s24, 0 }
  0x7e   : > { %p895_p12 = scmp.ge.s32.totalorder %s633_s14, 2  ;;  %s295_s20 = scalar_lea.sflag [#allocation4], %s294_s21 }
  0x80   : > { %p427_p1 = pnand %p895_p12, %p894_p10 }
  0x82   : > { %608 = dma.done.wait (!%p427_p1), %s295_s20, 384  }
  0x83   : > { %610 = vsyncadd (!%p427_p1), %s295_s20, 4294966912  ;;  %s21_s14 = sadd.s32 1, %s633_s14   ;;  %s896_s9 = smov %s617_s10 }
  0x84   : > { %p18_p2 = scmp.ge.s32.totalorder %s21_s14, 4   ;;  %s897_s10 = smov %s621_s11 }
  0x85   : > { %s898_s11 = smov %s711_s23  ;;  %s899_s12 = smov %s629_s13 }
  0x86   : > { %s900_s13 = smov %s902_s17  ;;  %20 = sbr.rel (!%p18_p2) target bundleno = 8 (0x8), region = 92 }
  0x8d   :  { %300 = vsyncpa [#allocation3], 1 }
  0x8e   :  { %302 = vsyncpa [#allocation3 + $0x1], 1 }
  0x8f   :  { %303 = vsyncpa [#allocation6], 1 }
  0x90   :  { %305 = vsyncpa [#allocation6 + $0x1], 1 }
  0x91   :  { %306 = vsyncpa [#allocation4], 1 }
  0x92   :  { %308 = vsyncpa [#allocation4 + $0x1], 1 }

</bundles_post_ra>
